<compile_context>
chip_gen: v6e
topology: v6e:2x2x1
jax: 0.10.0
libtpu: 0.0.40
codegen_flags: <defaults>
</compile_context>

<pallas_src>
import functools

import numpy as np
import jax
import jax.numpy as jnp
from jax import lax
from jax.experimental import pallas as pl
from jax.experimental.pallas import tpu as pltpu


def _layernorm(x, gamma, beta, eps=1e-5):
    # PyTorch nn.LayerNorm: biased variance over the last dim, eps inside rsqrt.
    mean = jnp.mean(x, axis=-1, keepdims=True)
    var = jnp.mean((x - mean) ** 2, axis=-1, keepdims=True)
    return (x - mean) * lax.rsqrt(var + eps) * gamma + beta


def encoder_layer_kernel(
    x_ref,                       # (S, E)  f32   tokens of the current batch
    wqkvh_ref, bqkvh_ref,        # (E, 3*hd) bf16, (1, 3*hd) f32  per-head in-proj
    woh_ref,                     # (hd, E) bf16  per-head rows of out-proj
    bo_ref,                      # (1, E)  f32   out-proj bias
    g1_ref, b1n_ref,             # (1, E)  f32   norm1 gamma / beta
    w1_ref, bff1_ref,            # (E, FF) bf16, (1, FF) f32  linear1
    w2_ref, bff2_ref,            # (FF, E) bf16, (1, E)  f32  linear2
    g2_ref, b2n_ref,             # (1, E)  f32   norm2 gamma / beta
    o_ref,                       # (S, E)        output tokens of this batch
    acc_ref,                     # (S, E)  f32   scratch: out-proj accumulator
    *, head_dim,
):
    f32 = jnp.float32
    bf16 = jnp.bfloat16
    hd = head_dim

    h = pl.program_id(1)
    last_h = pl.num_programs(1) - 1

    x = x_ref[...]                                           # (S, E) f32

    @pl.when(h == 0)
    def _init():
        acc_ref[...] = jnp.zeros_like(acc_ref)

    # ---- Per-head QKV projection (1/sqrt(hd) already folded into Wq / bq).
    qkv = jnp.dot(x.astype(bf16), wqkvh_ref[...],
                  preferred_element_type=f32) + bqkvh_ref[...]   # (S, 3*hd)
    q = qkv[:, :hd].astype(bf16)
    k = qkv[:, hd:2 * hd].astype(bf16)
    v = qkv[:, 2 * hd:].astype(bf16)

    # ---- Scores (S, S): contract head_dim of q and k (q @ k^T on the MXU).
    s = lax.dot_general(q, k, (((1,), (1,)), ((), ())),
                        preferred_element_type=f32)
    # Softmax over keys (f32, max-subtracted); reciprocal on the EUP.
    s = s - jnp.max(s, axis=-1, keepdims=True)
    p = jnp.exp(s)
    p = p * pl.reciprocal(jnp.sum(p, axis=-1, keepdims=True), approx=True)

    # ---- Head output folded straight through this head's slice of the
    # out-projection; summing over heads == concat-then-project.
    oh = jnp.dot(p.astype(bf16), v, preferred_element_type=f32)      # (S, hd)
    acc_ref[...] += jnp.dot(oh.astype(bf16), woh_ref[...],
                            preferred_element_type=f32)              # (S, E)

    # ---- Finalize on the last head: residuals, LayerNorms, feed-forward.
    @pl.when(h == last_h)
    def _finalize():
        attn = acc_ref[...] + bo_ref[...]
        # TODO(synk): dropout / dropout1 / dropout2 are identity (eval mode).
        src1 = _layernorm(x + attn, g1_ref[...], b1n_ref[...])

        h1 = jnp.dot(src1.astype(bf16), w1_ref[...],
                     preferred_element_type=f32) + bff1_ref[...]
        h1 = 0.5 * h1 * (1.0 + lax.erf(h1 * 0.7071067811865476))     # F.gelu (erf)
        y = jnp.dot(h1.astype(bf16), w2_ref[...],
                    preferred_element_type=f32) + bff2_ref[...]

        out = _layernorm(src1 + y, g2_ref[...], b2n_ref[...])
        o_ref[...] = out.astype(o_ref.dtype)


def prepare_params(params, num_heads):
    """One-time host-side parameter transform (not a per-call wrapper op):
    fold the query scale into Wq/bq, split the in/out projections per head,
    and pre-cast the matmul weights to bf16 (biases / norm params stay f32)."""
    wqkv = np.asarray(params["wqkv_t"], np.float32).copy()    # (E, 3E)
    bqkv = np.asarray(params["bqkv"], np.float32).copy()      # (1, 3E)
    E = wqkv.shape[0]
    H = num_heads
    hd = E // H
    scale = 1.0 / float(hd) ** 0.5
    wqkv[:, :E] *= scale                                      # fold q scaling
    bqkv[:, :E] *= scale

    def head_cols(a, h):                                      # [Wq_h | Wk_h | Wv_h]
        return np.concatenate(
            [a[:, h * hd:(h + 1) * hd],
             a[:, E + h * hd:E + (h + 1) * hd],
             a[:, 2 * E + h * hd:2 * E + (h + 1) * hd]], axis=1)

    wqkv_heads = np.stack([head_cols(wqkv, h) for h in range(H)], 0)  # (H, E, 3hd)
    bqkv_heads = np.stack([head_cols(bqkv, h) for h in range(H)], 0)  # (H, 1, 3hd)

    wo = np.asarray(params["wo_t"], np.float32)                       # (E, E)
    wo_heads = np.stack([wo[h * hd:(h + 1) * hd, :] for h in range(H)], 0)  # (H, hd, E)

    bf16, f32 = jnp.bfloat16, jnp.float32
    return {
        "wqkv_heads": jnp.asarray(wqkv_heads, bf16),
        "bqkv_heads": jnp.asarray(bqkv_heads, f32),
        "wo_heads": jnp.asarray(wo_heads, bf16),
        "bo": jnp.asarray(params["bo"], f32),
        "gamma1": jnp.asarray(params["gamma1"], f32),
        "beta1": jnp.asarray(params["beta1"], f32),
        "w1_t": jnp.asarray(params["w1_t"], bf16),
        "b1": jnp.asarray(params["b1"], f32),
        "w2_t": jnp.asarray(params["w2_t"], bf16),
        "b2": jnp.asarray(params["b2"], f32),
        "gamma2": jnp.asarray(params["gamma2"], f32),
        "beta2": jnp.asarray(params["beta2"], f32),
    }


def transformer_encoder_layer(src, prepped, num_heads):
    """src: (S, B, E) float32 — PyTorch nn.MultiheadAttention default layout."""
    S, B, E = src.shape
    H = num_heads
    hd = E // H

    # One cheap layout op so the grid's batch axis selects whole-batch blocks.
    x = jnp.transpose(src, (1, 0, 2))                         # (B, S, E)

    def fixed(arr):
        nd = arr.ndim
        return pl.BlockSpec(arr.shape, lambda b, h, nd=nd: (0,) * nd)

    in_specs = [
        pl.BlockSpec((None, S, E), lambda b, h: (b, 0, 0)),        # x (per batch)
        pl.BlockSpec((None, E, 3 * hd), lambda b, h: (h, 0, 0)),   # per-head Wqkv
        pl.BlockSpec((None, 1, 3 * hd), lambda b, h: (h, 0, 0)),   # per-head bqkv
        pl.BlockSpec((None, hd, E), lambda b, h: (h, 0, 0)),       # per-head Wo rows
        fixed(prepped["bo"]),
        fixed(prepped["gamma1"]), fixed(prepped["beta1"]),
        fixed(prepped["w1_t"]), fixed(prepped["b1"]),
        fixed(prepped["w2_t"]), fixed(prepped["b2"]),
        fixed(prepped["gamma2"]), fixed(prepped["beta2"]),
    ]
    out_specs = pl.BlockSpec((None, S, E), lambda b, h: (b, 0, 0))

    out = pl.pallas_call(
        functools.partial(encoder_layer_kernel, head_dim=hd),
        out_shape=jax.ShapeDtypeStruct((B, S, E), src.dtype),
        grid=(B, H),                              # batch parallel, head reduction
        in_specs=in_specs,
        out_specs=out_specs,
        scratch_shapes=[pltpu.VMEM((S, E), jnp.float32)],
        compiler_params=pltpu.CompilerParams(
            dimension_semantics=("parallel", "arbitrary"),
            vmem_limit_bytes=32 * 1024 * 1024),
    )(
        x,
        prepped["wqkv_heads"], prepped["bqkv_heads"], prepped["wo_heads"],
        prepped["bo"],
        prepped["gamma1"], prepped["beta1"],
        prepped["w1_t"], prepped["b1"],
        prepped["w2_t"], prepped["b2"],
        prepped["gamma2"], prepped["beta2"],
    )

    return jnp.transpose(out, (1, 0, 2))                      # back to (S, B, E)


def _reference(src, p, H):
    """Pure-JAX f32 mirror of the PyTorch forward (eval mode) for verification."""
    S, B, E = src.shape
    hd = E // H
    x2 = src.reshape(S * B, E)
    qkv = x2 @ p["wqkv_t"] + p["bqkv"]
    q, k, v = qkv[:, :E], qkv[:, E:2 * E], qkv[:, 2 * E:]

    def split(a):  # (S*B, E) -> (B, H, S, hd)
        return a.reshape(S, B, H, hd).transpose(1, 2, 0, 3)

    qh, kh, vh = split(q), split(k), split(v)
    s = jnp.einsum('bhsd,bhtd->bhst', qh, kh) / np.sqrt(hd)
    pw = jax.nn.softmax(s, axis=-1)
    o = jnp.einsum('bhst,bhtd->bhsd', pw, vh)
    o = o.transpose(2, 0, 1, 3).reshape(S * B, E)
    attn = o @ p["wo_t"] + p["bo"]

    def ln(z, g, b):
        m = z.mean(-1, keepdims=True)
        vv = ((z - m) ** 2).mean(-1, keepdims=True)
        return (z - m) / jnp.sqrt(vv + 1e-5) * g + b

    src1 = ln(x2 + attn, p["gamma1"], p["beta1"])
    h1 = src1 @ p["w1_t"] + p["b1"]
    h1 = 0.5 * h1 * (1.0 + lax.erf(h1 * 0.7071067811865476))
    y = h1 @ p["w2_t"] + p["b2"]
    out = ln(src1 + y, p["gamma2"], p["beta2"])
    return out.reshape(S, B, E)


if __name__ == "__main__":
    # Small shapes consistent with the module: seq=8, batch=2, d_model=32,
    # nhead=4, dim_feedforward=64.
    S, B, E, H, FF = 8, 2, 32, 4, 64

    key = jax.random.PRNGKey(0)
    keys = jax.random.split(key, 10)
    init = lambda k, shape: jax.random.normal(k, shape, jnp.float32) * 0.02

    params = {
        # nn.MultiheadAttention: in_proj_weight (3E, E) — stored pre-transposed.
        "wqkv_t": init(keys[0], (E, 3 * E)),
        "bqkv":   init(keys[1], (1, 3 * E)),
        # out_proj: Linear(E, E) — stored pre-transposed.
        "wo_t":   init(keys[2], (E, E)),
        "bo":     init(keys[3], (1, E)),
        # nn.LayerNorm(d_model): default affine init gamma=1, beta=0.
        "gamma1": jnp.ones((1, E), jnp.float32),
        "beta1":  jnp.zeros((1, E), jnp.float32),
        # linear1: Linear(d_model, dim_feedforward) — stored pre-transposed.
        "w1_t":   init(keys[4], (E, FF)),
        "b1":     init(keys[5], (1, FF)),
        # linear2: Linear(dim_feedforward, d_model) — stored pre-transposed.
        "w2_t":   init(keys[6], (FF, E)),
        "b2":     init(keys[7], (1, E)),
        "gamma2": jnp.ones((1, E), jnp.float32),
        "beta2":  jnp.zeros((1, E), jnp.float32),
    }

    src = jax.random.normal(keys[8], (S, B, E), jnp.float32)

    prepped = prepare_params(params, H)          # one-time host transform
    out = transformer_encoder_layer(src, prepped, H)
    jax.block_until_ready(out)
    assert out.shape == (S, B, E) and out.dtype == jnp.float32

    ref = _reference(src, params, H)
    assert bool(jnp.allclose(out, ref, atol=2e-2, rtol=2e-2)), "mismatch vs reference"

    print("KERNEL_OK")
</pallas_src>

<mosaic_0001>
module attributes {stable_mosaic.version = 11 : i64} {
  func.func @encoder_layer_kernel(%arg0: i32, %arg1: i32, %arg2: memref<1x8x32xf32, #tpu.memory_space<vmem>>, %arg3: memref<1x32x24xbf16, #tpu.memory_space<vmem>>, %arg4: memref<1x1x24xf32, #tpu.memory_space<vmem>>, %arg5: memref<1x8x32xbf16, #tpu.memory_space<vmem>>, %arg6: memref<1x32xf32, #tpu.memory_space<vmem>>, %arg7: memref<1x32xf32, #tpu.memory_space<vmem>>, %arg8: memref<1x32xf32, #tpu.memory_space<vmem>>, %arg9: memref<32x64xbf16, #tpu.memory_space<vmem>>, %arg10: memref<1x64xf32, #tpu.memory_space<vmem>>, %arg11: memref<64x32xbf16, #tpu.memory_space<vmem>>, %arg12: memref<1x32xf32, #tpu.memory_space<vmem>>, %arg13: memref<1x32xf32, #tpu.memory_space<vmem>>, %arg14: memref<1x32xf32, #tpu.memory_space<vmem>>, %arg15: memref<1x8x32xf32, #tpu.memory_space<vmem>>, %arg16: memref<8x32xf32, #tpu.memory_space<vmem>>) attributes {dimension_semantics = [#tpu.dimension_semantics<parallel>, #tpu.dimension_semantics<arbitrary>], iteration_bounds = array<i64: 2, 4>, scalar_prefetch = 0 : i64, scratch_operands = 1 : i64, tpu.core_type = #tpu.core_type<tc>, window_params = [{transform_indices = @transform_0, window_bounds = array<i64: 1, 8, 32>}, {transform_indices = @transform_1, window_bounds = array<i64: 1, 32, 24>}, {transform_indices = @transform_2, window_bounds = array<i64: 1, 1, 24>}, {transform_indices = @transform_3, window_bounds = array<i64: 1, 8, 32>}, {pipeline_mode = #tpu.pipeline_mode<synchronous>, transform_indices = @transform_4, window_bounds = array<i64: 1, 32>}, {pipeline_mode = #tpu.pipeline_mode<synchronous>, transform_indices = @transform_5, window_bounds = array<i64: 1, 32>}, {pipeline_mode = #tpu.pipeline_mode<synchronous>, transform_indices = @transform_6, window_bounds = array<i64: 1, 32>}, {pipeline_mode = #tpu.pipeline_mode<synchronous>, transform_indices = @transform_7, window_bounds = array<i64: 32, 64>}, {pipeline_mode = #tpu.pipeline_mode<synchronous>, transform_indices = @transform_8, window_bounds = array<i64: 1, 64>}, {pipeline_mode = #tpu.pipeline_mode<synchronous>, transform_indices = @transform_9, window_bounds = array<i64: 64, 32>}, {pipeline_mode = #tpu.pipeline_mode<synchronous>, transform_indices = @transform_10, window_bounds = array<i64: 1, 32>}, {pipeline_mode = #tpu.pipeline_mode<synchronous>, transform_indices = @transform_11, window_bounds = array<i64: 1, 32>}, {pipeline_mode = #tpu.pipeline_mode<synchronous>, transform_indices = @transform_12, window_bounds = array<i64: 1, 32>}, {transform_indices = @transform_13, window_bounds = array<i64: 1, 8, 32>}]} {
    %c0 = arith.constant 0 : index
    %c0_0 = arith.constant 0 : index
    %c0_1 = arith.constant 0 : index
    %0 = vector.load %arg2[%c0, %c0_0, %c0_1] : memref<1x8x32xf32, #tpu.memory_space<vmem>>, vector<1x8x32xf32>
    %1 = vector.shape_cast %0 : vector<1x8x32xf32> to vector<8x32xf32>
    %c0_i32 = arith.constant 0 : i32
    %2 = arith.cmpi eq, %arg1, %c0_i32 : i32
    %3 = arith.extui %2 : i1 to i32
    %c0_i32_2 = arith.constant 0 : i32
    %4 = arith.cmpi ne, %3, %c0_i32_2 : i32
    scf.if %4 {
      %cst_22 = arith.constant 0.000000e+00 : f32
      %42 = vector.broadcast %cst_22 : f32 to vector<8x32xf32>
      %c0_23 = arith.constant 0 : index
      %c0_24 = arith.constant 0 : index
      %43 = vector.load %arg16[%c0_23, %c0_24] : memref<8x32xf32, #tpu.memory_space<vmem>>, vector<8x32xf32>
      tpu.vector_store %arg16[%c0_23, %c0_24], %42 {strides = array<i32>} : memref<8x32xf32, #tpu.memory_space<vmem>>, vector<8x32xf32>,
    } else {
    }
    %5 = arith.truncf %1 : vector<8x32xf32> to vector<8x32xbf16>
    %c0_3 = arith.constant 0 : index
    %c0_4 = arith.constant 0 : index
    %c0_5 = arith.constant 0 : index
    %6 = vector.load %arg3[%c0_3, %c0_4, %c0_5] : memref<1x32x24xbf16, #tpu.memory_space<vmem>>, vector<1x32x24xbf16>
    %7 = vector.shape_cast %6 : vector<1x32x24xbf16> to vector<32x24xbf16>
    %cst = arith.constant dense<0.000000e+00> : vector<8x24xf32>
    %8 = tpu.matmul %5, %7, %cst {dimension_numbers = #tpu.dot_dimension_numbers<[1], [0], [0], [1], [0, 0, 1, 1], [], []>} : vector<8x32xbf16>, vector<32x24xbf16>, vector<8x24xf32> -> vector<8x24xf32>
    %c0_6 = arith.constant 0 : index
    %c0_7 = arith.constant 0 : index
    %c0_8 = arith.constant 0 : index
    %9 = vector.load %arg4[%c0_6, %c0_7, %c0_8] : memref<1x1x24xf32, #tpu.memory_space<vmem>>, vector<1x1x24xf32>
    %10 = vector.shape_cast %9 : vector<1x1x24xf32> to vector<1x24xf32>
    %11 = vector.broadcast %10 : vector<1x24xf32> to vector<8x24xf32>
    %12 = arith.addf %8, %11 : vector<8x24xf32>
    %13 = vector.extract_strided_slice %12 {offsets = [0, 0], sizes = [8, 8], strides = [1, 1]} : vector<8x24xf32> to vector<8x8xf32>
    %14 = arith.truncf %13 : vector<8x8xf32> to vector<8x8xbf16>
    %15 = vector.extract_strided_slice %12 {offsets = [0, 8], sizes = [8, 8], strides = [1, 1]} : vector<8x24xf32> to vector<8x8xf32>
    %16 = arith.truncf %15 : vector<8x8xf32> to vector<8x8xbf16>
    %17 = vector.extract_strided_slice %12 {offsets = [0, 16], sizes = [8, 8], strides = [1, 1]} : vector<8x24xf32> to vector<8x8xf32>
    %18 = arith.truncf %17 : vector<8x8xf32> to vector<8x8xbf16>
    %cst_9 = arith.constant dense<0.000000e+00> : vector<8x8xf32>
    %19 = tpu.matmul %14, %16, %cst_9 {dimension_numbers = #tpu.dot_dimension_numbers<[1], [1], [0], [0], [0, 0, 1, 0], [], []>} : vector<8x8xbf16>, vector<8x8xbf16>, vector<8x8xf32> -> vector<8x8xf32>
    %cst_10 = arith.constant dense<0xFF800000> : vector<8xf32>
    %20 = vector.multi_reduction <maximumf>, %19, %cst_10 [1] : vector<8x8xf32> to vector<8xf32>
    %21 = vector.shape_cast %20 : vector<8xf32> to vector<8x1xf32>
    %22 = vector.broadcast %21 : vector<8x1xf32> to vector<8x8xf32>
    %23 = arith.subf %19, %22 : vector<8x8xf32>
    %24 = math.exp %23 : vector<8x8xf32>
    %cst_11 = arith.constant dense<0.000000e+00> : vector<8xf32>
    %25 = vector.multi_reduction <add>, %24, %cst_11 [1] : vector<8x8xf32> to vector<8xf32>
    %26 = vector.shape_cast %25 : vector<8xf32> to vector<8x1xf32>
    %27 = tpu.reciprocal %26 {approx = true} : vector<8x1xf32> -> vector<8x1xf32>
    %28 = vector.broadcast %27 : vector<8x1xf32> to vector<8x8xf32>
    %29 = arith.mulf %24, %28 : vector<8x8xf32>
    %30 = arith.truncf %29 : vector<8x8xf32> to vector<8x8xbf16>
    %cst_12 = arith.constant dense<0.000000e+00> : vector<8x8xf32>
    %31 = tpu.matmul %30, %18, %cst_12 {dimension_numbers = #tpu.dot_dimension_numbers<[1], [0], [0], [1], [0, 0, 1, 1], [], []>} : vector<8x8xbf16>, vector<8x8xbf16>, vector<8x8xf32> -> vector<8x8xf32>
    %c0_13 = arith.constant 0 : index
    %c0_14 = arith.constant 0 : index
    %32 = vector.load %arg16[%c0_13, %c0_14] : memref<8x32xf32, #tpu.memory_space<vmem>>, vector<8x32xf32>
    %33 = arith.truncf %31 : vector<8x8xf32> to vector<8x8xbf16>
    %c0_15 = arith.constant 0 : index
    %c0_16 = arith.constant 0 : index
    %c0_17 = arith.constant 0 : index
    %34 = vector.load %arg5[%c0_15, %c0_16, %c0_17] : memref<1x8x32xbf16, #tpu.memory_space<vmem>>, vector<1x8x32xbf16>
    %35 = vector.shape_cast %34 : vector<1x8x32xbf16> to vector<8x32xbf16>
    %cst_18 = arith.constant dense<0.000000e+00> : vector<8x32xf32>
    %36 = tpu.matmul %33, %35, %cst_18 {dimension_numbers = #tpu.dot_dimension_numbers<[1], [0], [0], [1], [0, 0, 1, 1], [], []>} : vector<8x8xbf16>, vector<8x32xbf16>, vector<8x32xf32> -> vector<8x32xf32>
    %37 = arith.addf %32, %36 : vector<8x32xf32>
    %c0_19 = arith.constant 0 : index
    %c0_20 = arith.constant 0 : index
    %38 = vector.load %arg16[%c0_19, %c0_20] : memref<8x32xf32, #tpu.memory_space<vmem>>, vector<8x32xf32>
    tpu.vector_store %arg16[%c0_19, %c0_20], %37 {strides = array<i32>} : memref<8x32xf32, #tpu.memory_space<vmem>>, vector<8x32xf32>,
    %c3_i32 = arith.constant 3 : i32
    %39 = arith.cmpi eq, %arg1, %c3_i32 : i32
    %40 = arith.extui %39 : i1 to i32
    %c0_i32_21 = arith.constant 0 : i32
    %41 = arith.cmpi ne, %40, %c0_i32_21 : i32
    scf.if %41 {
      %c0_22 = arith.constant 0 : index
      %c0_23 = arith.constant 0 : index
      %42 = vector.load %arg16[%c0_22, %c0_23] : memref<8x32xf32, #tpu.memory_space<vmem>>, vector<8x32xf32>
      %c0_24 = arith.constant 0 : index
      %c0_25 = arith.constant 0 : index
      %43 = vector.load %arg6[%c0_24, %c0_25] : memref<1x32xf32, #tpu.memory_space<vmem>>, vector<1x32xf32>
      %44 = vector.broadcast %43 : vector<1x32xf32> to vector<8x32xf32>
      %45 = arith.addf %42, %44 : vector<8x32xf32>
      %46 = arith.addf %1, %45 : vector<8x32xf32>
      %c0_26 = arith.constant 0 : index
      %c0_27 = arith.constant 0 : index
      %47 = vector.load %arg7[%c0_26, %c0_27] : memref<1x32xf32, #tpu.memory_space<vmem>>, vector<1x32xf32>
      %c0_28 = arith.constant 0 : index
      %c0_29 = arith.constant 0 : index
      %48 = vector.load %arg8[%c0_28, %c0_29] : memref<1x32xf32, #tpu.memory_space<vmem>>, vector<1x32xf32>
      %cst_30 = arith.constant dense<0.000000e+00> : vector<8xf32>
      %49 = vector.multi_reduction <add>, %46, %cst_30 [1] : vector<8x32xf32> to vector<8xf32>
      %50 = vector.shape_cast %49 : vector<8xf32> to vector<8x1xf32>
      %cst_31 = arith.constant 3.200000e+01 : f32
      %51 = vector.broadcast %cst_31 : f32 to vector<8x1xf32>
      %52 = arith.divf %50, %51 : vector<8x1xf32>
      %53 = vector.broadcast %52 : vector<8x1xf32> to vector<8x32xf32>
      %54 = arith.subf %46, %53 : vector<8x32xf32>
      %55 = arith.mulf %54, %54 : vector<8x32xf32>
      %cst_32 = arith.constant dense<0.000000e+00> : vector<8xf32>
      %56 = vector.multi_reduction <add>, %55, %cst_32 [1] : vector<8x32xf32> to vector<8xf32>
      %57 = vector.shape_cast %56 : vector<8xf32> to vector<8x1xf32>
      %cst_33 = arith.constant 3.200000e+01 : f32
      %58 = vector.broadcast %cst_33 : f32 to vector<8x1xf32>
      %59 = arith.divf %57, %58 : vector<8x1xf32>
      %60 = vector.broadcast %52 : vector<8x1xf32> to vector<8x32xf32>
      %61 = arith.subf %46, %60 : vector<8x32xf32>
      %cst_34 = arith.constant 9.99999974E-6 : f32
      %62 = vector.broadcast %cst_34 : f32 to vector<8x1xf32>
      %63 = arith.addf %59, %62 : vector<8x1xf32>
      %64 = math.rsqrt %63 : vector<8x1xf32>
      %65 = vector.broadcast %64 : vector<8x1xf32> to vector<8x32xf32>
      %66 = arith.mulf %61, %65 : vector<8x32xf32>
      %67 = vector.broadcast %47 : vector<1x32xf32> to vector<8x32xf32>
      %68 = arith.mulf %66, %67 : vector<8x32xf32>
      %69 = vector.broadcast %48 : vector<1x32xf32> to vector<8x32xf32>
      %70 = arith.addf %68, %69 : vector<8x32xf32>
      %71 = arith.truncf %70 : vector<8x32xf32> to vector<8x32xbf16>
      %c0_35 = arith.constant 0 : index
      %c0_36 = arith.constant 0 : index
      %72 = vector.load %arg9[%c0_35, %c0_36] : memref<32x64xbf16, #tpu.memory_space<vmem>>, vector<32x64xbf16>
      %cst_37 = arith.constant dense<0.000000e+00> : vector<8x64xf32>
      %73 = tpu.matmul %71, %72, %cst_37 {dimension_numbers = #tpu.dot_dimension_numbers<[1], [0], [0], [1], [0, 0, 1, 1], [], []>} : vector<8x32xbf16>, vector<32x64xbf16>, vector<8x64xf32> -> vector<8x64xf32>
      %c0_38 = arith.constant 0 : index
      %c0_39 = arith.constant 0 : index
      %74 = vector.load %arg10[%c0_38, %c0_39] : memref<1x64xf32, #tpu.memory_space<vmem>>, vector<1x64xf32>
      %75 = vector.broadcast %74 : vector<1x64xf32> to vector<8x64xf32>
      %76 = arith.addf %73, %75 : vector<8x64xf32>
      %cst_40 = arith.constant 5.000000e-01 : f32
      %77 = vector.broadcast %cst_40 : f32 to vector<8x64xf32>
      %78 = arith.mulf %77, %76 : vector<8x64xf32>
      %cst_41 = arith.constant 0.707106769 : f32
      %79 = vector.broadcast %cst_41 : f32 to vector<8x64xf32>
      %80 = arith.mulf %76, %79 : vector<8x64xf32>
      %81 = math.erf %80 : vector<8x64xf32>
      %cst_42 = arith.constant 1.000000e+00 : f32
      %82 = vector.broadcast %cst_42 : f32 to vector<8x64xf32>
      %83 = arith.addf %82, %81 : vector<8x64xf32>
      %84 = arith.mulf %78, %83 : vector<8x64xf32>
      %85 = arith.truncf %84 : vector<8x64xf32> to vector<8x64xbf16>
      %c0_43 = arith.constant 0 : index
      %c0_44 = arith.constant 0 : index
      %86 = vector.load %arg11[%c0_43, %c0_44] : memref<64x32xbf16, #tpu.memory_space<vmem>>, vector<64x32xbf16>
      %cst_45 = arith.constant dense<0.000000e+00> : vector<8x32xf32>
      %87 = tpu.matmul %85, %86, %cst_45 {dimension_numbers = #tpu.dot_dimension_numbers<[1], [0], [0], [1], [0, 0, 1, 1], [], []>} : vector<8x64xbf16>, vector<64x32xbf16>, vector<8x32xf32> -> vector<8x32xf32>
      %c0_46 = arith.constant 0 : index
      %c0_47 = arith.constant 0 : index
      %88 = vector.load %arg12[%c0_46, %c0_47] : memref<1x32xf32, #tpu.memory_space<vmem>>, vector<1x32xf32>
      %89 = vector.broadcast %88 : vector<1x32xf32> to vector<8x32xf32>
      %90 = arith.addf %87, %89 : vector<8x32xf32>
      %91 = arith.addf %70, %90 : vector<8x32xf32>
      %c0_48 = arith.constant 0 : index
      %c0_49 = arith.constant 0 : index
      %92 = vector.load %arg13[%c0_48, %c0_49] : memref<1x32xf32, #tpu.memory_space<vmem>>, vector<1x32xf32>
      %c0_50 = arith.constant 0 : index
      %c0_51 = arith.constant 0 : index
      %93 = vector.load %arg14[%c0_50, %c0_51] : memref<1x32xf32, #tpu.memory_space<vmem>>, vector<1x32xf32>
      %cst_52 = arith.constant dense<0.000000e+00> : vector<8xf32>
      %94 = vector.multi_reduction <add>, %91, %cst_52 [1] : vector<8x32xf32> to vector<8xf32>
      %95 = vector.shape_cast %94 : vector<8xf32> to vector<8x1xf32>
      %cst_53 = arith.constant 3.200000e+01 : f32
      %96 = vector.broadcast %cst_53 : f32 to vector<8x1xf32>
      %97 = arith.divf %95, %96 : vector<8x1xf32>
      %98 = vector.broadcast %97 : vector<8x1xf32> to vector<8x32xf32>
      %99 = arith.subf %91, %98 : vector<8x32xf32>
      %100 = arith.mulf %99, %99 : vector<8x32xf32>
      %cst_54 = arith.constant dense<0.000000e+00> : vector<8xf32>
      %101 = vector.multi_reduction <add>, %100, %cst_54 [1] : vector<8x32xf32> to vector<8xf32>
      %102 = vector.shape_cast %101 : vector<8xf32> to vector<8x1xf32>
      %cst_55 = arith.constant 3.200000e+01 : f32
      %103 = vector.broadcast %cst_55 : f32 to vector<8x1xf32>
      %104 = arith.divf %102, %103 : vector<8x1xf32>
      %105 = vector.broadcast %97 : vector<8x1xf32> to vector<8x32xf32>
      %106 = arith.subf %91, %105 : vector<8x32xf32>
      %cst_56 = arith.constant 9.99999974E-6 : f32
      %107 = vector.broadcast %cst_56 : f32 to vector<8x1xf32>
      %108 = arith.addf %104, %107 : vector<8x1xf32>
      %109 = math.rsqrt %108 : vector<8x1xf32>
      %110 = vector.broadcast %109 : vector<8x1xf32> to vector<8x32xf32>
      %111 = arith.mulf %106, %110 : vector<8x32xf32>
      %112 = vector.broadcast %92 : vector<1x32xf32> to vector<8x32xf32>
      %113 = arith.mulf %111, %112 : vector<8x32xf32>
      %114 = vector.broadcast %93 : vector<1x32xf32> to vector<8x32xf32>
      %115 = arith.addf %113, %114 : vector<8x32xf32>
      %c0_57 = arith.constant 0 : index
      %c0_58 = arith.constant 0 : index
      %c0_59 = arith.constant 0 : index
      %116 = vector.load %arg15[%c0_57, %c0_58, %c0_59] : memref<1x8x32xf32, #tpu.memory_space<vmem>>, vector<1x8x32xf32>
      %117 = vector.shape_cast %116 : vector<1x8x32xf32> to vector<8x32xf32>
      %118 = vector.shape_cast %115 : vector<8x32xf32> to vector<1x8x32xf32>
      tpu.vector_store %arg15[%c0_57, %c0_58, %c0_59], %118 {strides = array<i32>} : memref<1x8x32xf32, #tpu.memory_space<vmem>>, vector<1x8x32xf32>,
    } else {
    }
    return
  }
  func.func @transform_0(%arg0: i32, %arg1: i32) -> (i32, i32, i32) {
    %c0_i32 = arith.constant 0 : i32
    %c0_i32_0 = arith.constant 0 : i32
    %c0_i32_1 = arith.constant 0 : i32
    return %arg0, %c0_i32, %c0_i32_0 : i32, i32, i32
  }
  func.func @transform_1(%arg0: i32, %arg1: i32) -> (i32, i32, i32) {
    %c0_i32 = arith.constant 0 : i32
    %c0_i32_0 = arith.constant 0 : i32
    %c0_i32_1 = arith.constant 0 : i32
    return %arg1, %c0_i32, %c0_i32_0 : i32, i32, i32
  }
  func.func @transform_2(%arg0: i32, %arg1: i32) -> (i32, i32, i32) {
    %c0_i32 = arith.constant 0 : i32
    %c0_i32_0 = arith.constant 0 : i32
    %c0_i32_1 = arith.constant 0 : i32
    return %arg1, %c0_i32, %c0_i32_0 : i32, i32, i32
  }
  func.func @transform_3(%arg0: i32, %arg1: i32) -> (i32, i32, i32) {
    %c0_i32 = arith.constant 0 : i32
    %c0_i32_0 = arith.constant 0 : i32
    %c0_i32_1 = arith.constant 0 : i32
    return %arg1, %c0_i32, %c0_i32_0 : i32, i32, i32
  }
  func.func @transform_4(%arg0: i32, %arg1: i32) -> (i32, i32) {
    %c0_i32 = arith.constant 0 : i32
    %c0_i32_0 = arith.constant 0 : i32
    %c0_i32_1 = arith.constant 0 : i32
    return %c0_i32, %c0_i32_0 : i32, i32
  }
  func.func @transform_5(%arg0: i32, %arg1: i32) -> (i32, i32) {
    %c0_i32 = arith.constant 0 : i32
    %c0_i32_0 = arith.constant 0 : i32
    %c0_i32_1 = arith.constant 0 : i32
    return %c0_i32, %c0_i32_0 : i32, i32
  }
  func.func @transform_6(%arg0: i32, %arg1: i32) -> (i32, i32) {
    %c0_i32 = arith.constant 0 : i32
    %c0_i32_0 = arith.constant 0 : i32
    %c0_i32_1 = arith.constant 0 : i32
    return %c0_i32, %c0_i32_0 : i32, i32
  }
  func.func @transform_7(%arg0: i32, %arg1: i32) -> (i32, i32) {
    %c0_i32 = arith.constant 0 : i32
    %c0_i32_0 = arith.constant 0 : i32
    %c0_i32_1 = arith.constant 0 : i32
    return %c0_i32, %c0_i32_0 : i32, i32
  }
  func.func @transform_8(%arg0: i32, %arg1: i32) -> (i32, i32) {
    %c0_i32 = arith.constant 0 : i32
    %c0_i32_0 = arith.constant 0 : i32
    %c0_i32_1 = arith.constant 0 : i32
    return %c0_i32, %c0_i32_0 : i32, i32
  }
  func.func @transform_9(%arg0: i32, %arg1: i32) -> (i32, i32) {
    %c0_i32 = arith.constant 0 : i32
    %c0_i32_0 = arith.constant 0 : i32
    %c0_i32_1 = arith.constant 0 : i32
    return %c0_i32, %c0_i32_0 : i32, i32
  }
  func.func @transform_10(%arg0: i32, %arg1: i32) -> (i32, i32) {
    %c0_i32 = arith.constant 0 : i32
    %c0_i32_0 = arith.constant 0 : i32
    %c0_i32_1 = arith.constant 0 : i32
    return %c0_i32, %c0_i32_0 : i32, i32
  }
  func.func @transform_11(%arg0: i32, %arg1: i32) -> (i32, i32) {
    %c0_i32 = arith.constant 0 : i32
    %c0_i32_0 = arith.constant 0 : i32
    %c0_i32_1 = arith.constant 0 : i32
    return %c0_i32, %c0_i32_0 : i32, i32
  }
  func.func @transform_12(%arg0: i32, %arg1: i32) -> (i32, i32) {
    %c0_i32 = arith.constant 0 : i32
    %c0_i32_0 = arith.constant 0 : i32
    %c0_i32_1 = arith.constant 0 : i32
    return %c0_i32, %c0_i32_0 : i32, i32
  }
  func.func @transform_13(%arg0: i32, %arg1: i32) -> (i32, i32, i32) {
    %c0_i32 = arith.constant 0 : i32
    %c0_i32_0 = arith.constant 0 : i32
    %c0_i32_1 = arith.constant 0 : i32
    return %arg0, %c0_i32, %c0_i32_0 : i32, i32, i32
  }
}

</mosaic_0001>

<bundles_post_ra>
// kernel: tpu_custom_call.1
= control target key start
LH: loop header
LB: loop body
LE: loop exit
PB: predicated region body
PF: predicated region fallthrough
CT: control target
= control target key end

     0   :  { %s1669_s0 = inlined_call_operand.vmem [shape: f32[2,8,32], index: 0, kind: input, shape index: {}]   ;;  %s1670_s1 = inlined_call_operand.vmem [shape: bf16[4,32,24], index: 1, kind: input, shape index: {}]   ;;  %s1671_s2 = inlined_call_operand.vmem [shape: f32[4,1,24], index: 2, kind: input, shape index: {}]   ;;  %s1672_s3 = inlined_call_operand.vmem [shape: bf16[4,8,32], index: 3, kind: input, shape index: {}]   ;;  %s1673_s4 = inlined_call_operand.vmem [shape: f32[1,32], index: 4, kind: input, shape index: {}]   ;;  %s1674_s5 = inlined_call_operand.vmem [shape: f32[1,32], index: 5, kind: input, shape index: {}]   ;;  %s1675_s6 = inlined_call_operand.vmem [shape: f32[1,32], index: 6, kind: input, shape index: {}]   ;;  %s1676_s7 = inlined_call_operand.vmem [shape: bf16[32,64], index: 7, kind: input, shape index: {}]   ;;  %s1677_s8 = inlined_call_operand.vmem [shape: f32[1,64], index: 8, kind: input, shape index: {}]   ;;  %s1678_s9 = inlined_call_operand.vmem [shape: bf16[64,32], index: 9, kind: input, shape index: {}]   ;;  %s1679_s10 = inlined_call_operand.vmem [shape: f32[1,32], index: 10, kind: input, shape index: {}]   ;;  %s1680_s11 = inlined_call_operand.vmem [shape: f32[1,32], index: 11, kind: input, shape index: {}]   ;;  %s1681_s12 = inlined_call_operand.vmem [shape: f32[1,32], index: 12, kind: input, shape index: {}]   ;;  %s1682_s13 = inlined_call_operand.hbm [shape: f32[2,8,32], index: 13, kind: output, shape index: {}]  }
   0x1   :  { %1697 = sst [smem:[#allocation18_spill]] %s1681_s12 }
   0x2   :  { %1698 = sst [smem:[#allocation19_spill]] %s1682_s13 }
   0x3   :  { %18 = vsyncpa [#allocation4], 0 }
   0x4   :  { %20 = vsyncpa [#allocation4 + $0x1], 0  ;;  %s1456_s25 = smov 0   ;;  %s1458_s26 = smov 0  }
   0x5   :  { %s1460_s27 = smov 0   ;;  %s1462_s28 = smov 0  }
   0x6   :  { %s1464_s29 = smov 0   ;;  %s1466_s30 = smov 0  }
   0x7   :  { %s1468_s14 = smov 0   ;;  %s1470_s15 = smov 0  }
   0x8 LB: > { %1699 = sst [smem:[#allocation6_spill]] %s1348_s25  ;;  %s1086_s16 = sadd.s32 4294967295, %s1376_s15   ;;  %s1376_s15 = sphi %s1470_s15, %s26_s15   ;;  %s1372_s14 = sphi %s1468_s14, %s1728_s14   ;;  %s1368_s30 = sphi %s1466_s30, %s1727_s30   ;;  %s1364_s29 = sphi %s1464_s29, %s1726_s29   ;;  %s1360_s28 = sphi %s1462_s28, %s1725_s28   ;;  %s1356_s27 = sphi %s1460_s27, %s1724_s27   ;;  %s1352_s26 = sphi %s1458_s26, %s1723_s26   ;;  %s1348_s25 = sphi %s1456_s25, %s1722_s25  }
   0x9   : > { %1700 = sst [smem:[#allocation7_spill]] %s1352_s26  ;;  %s1087_s17 = sadd.s32 4294967294, %s1376_s15  }
   0xa   : > { %1701 = sst [smem:[#allocation8_spill]] %s1356_s27  ;;  %s35_s18 = sadd.s32 1, %s1368_s30 }
   0xb   : > { %1702 = sst [smem:[#allocation9_spill]] %s1364_s29  ;;  %p36_p0 = scmp.ge.s32.totalorder %s35_s18, 4 }
   0xc   : > { %1703 = sst [smem:[#allocation10_spill]] %s1368_s30  ;;  %s38_s19 = sadd.s32 1, %s1372_s14 }
   0xd   : > { %1704 = sst [smem:[#allocation11_spill]] %s1372_s14  ;;  %p348_p1 = scmp.ne.s32.totalorder %s1356_s27, %s1352_s26 }
   0xe   : > { %1705 = sst [smem:[#allocation12_spill]] %s1376_s15  ;;  %p349_p2 = scmp.eq.s32.totalorder %s1086_s16, 7 }
   0xf   : > { %s1730_s18 = smov (%p36_p0, %s35_s18), 0  ;;  %s1732_s19 = smov (!%p36_p0, %s38_s19), %s1372_s14 }
  0x10   : > { %1706 = sst [smem:[#allocation13_spill]] %s1730_s18  ;;  %p1505_p3 = por %p349_p2, %p348_p1 }
  0x11   : > { %p354_p4 = scmp.ne.s32.totalorder %s1352_s26, %s1348_s25  ;;  %p40_p5 = scmp.ge.s32.totalorder %s1732_s19, 2 }
  0x12   : > { %s1707_s20 = scalar_select %p1505_p3, 1, 0 }
  0x13   : > { %p355_p6 = scmp.eq.s32.totalorder %s1087_s17, 7  ;;  %p1090_p7 = scmp.ge.s32.totalorder %s1376_s15, 1 }
  0x14   : > { %1708 = sst [smem:[#allocation14_spill]] %s1707_s20  ;;  %p428_p8 = scmp.lt.s32.totalorder %s1376_s15, 9 }
  0x15   : > { %s1734_s19 = smov (%p40_p5, %s1732_s19), 0  ;;  %p1515_p9 = por %p355_p6, %p354_p4 }
  0x16   : > { %1709 = sst [smem:[#allocation15_spill]] %s1734_s19  ;;  %p429_p10 = pnand %p1090_p7, %p428_p8 }
  0x17   : > { %s1710_s21 = scalar_select %p1515_p9, 1, 0 }
  0x18   : > { %s335_s22 = ssub.s32 %s1372_s14, %s1734_s19  ;;  %s338_s23 = sadd.s32 1, %s1356_s27 }
  0x19   : > { %1711 = sst [smem:[#allocation16_spill]] %s1710_s21  ;;  %p336_p11 = scmp.eq.s32.totalorder %s335_s22, 0 }
  0x1a   : > { %432 = sbr.rel (%p429_p10) target bundleno = 2336 (0x920), region = 72  ;;  %s1689_s16 = sand.u32 (!%p429_p10), 1, %s1352_s26  }
  0x1b   : > { %s1523_s24 = scalar_select %p336_p11, %s1356_s27, %s338_s23  }
  0x1c   : > { %p483_p12 = scmp.lt.s32.totalorder (!%p429_p10), %s1364_s29, 1  ;;  %s1529_s17 = sshll.u32 (!%p429_p10), %s1689_s16, 3 }
  0x1d   : > { %1712 = sst [smem:[#allocation17_spill]] %s1523_s24  ;;  %p487_p13 = scmp.lt.s32.totalorder (!%p429_p10), %s1360_s28, 3 }
  0x1e   : > { %s482_s12 = scalar_lea.vmem (!%p429_p10), [#allocation3], %s1529_s17  ;;  %p1096_p0 = scmp.ne.s32.totalorder (!%p429_p10), %s1360_s28, 0 }
  0x1f   : > { %s484_s18 = scalar_select %p483_p12, %s1364_s29, 1 }
  0x20   : > { %s1534_s19 = scalar_select %p487_p13, %s1360_s28, 3 }
  0x21   : > { %s1092_s22 = sshll.u32 %s484_s18, 3  ;;  %504 = sbr.rel (%p1096_p0) target bundleno = 40 (0x28), region = 76 }
  0x22   : > { %s486_s30 = scalar_lea.vmem %s1669_s0, %s1092_s22  ;;  %s1124_s24 = sshll.u32 %s1534_s19, 4 }
  0x23   : > { %s491_s25 = scalar_lea.vmem %s1670_s1, %s1124_s24  ;;  %s494_s13 = scalar_lea.vmem %s1671_s2, %s1534_s19  ;;  %v1547_v0 = vld [vmem:[%s486_s30] sm:$0xff] }
  0x24   : > { %s1095_s20 = sshll.u32 %s1534_s19, 2 }
  0x25   : > { %s1553_s18 = scalar_lea.vmem %s1672_s3, %s1095_s20 }
  0x26   : > { %vm505_vm0 = vcmask 261120   ;;  %v1378_v1 = vmov 0.0  }
  0x27   : > { %506 = vst.msk [vmem:[#allocation2] sm:$0xff] %vm505_vm0, %v1378_v1 }
  0x28 PF: > { %v1266_v2 = vld [vmem:[%s491_s25 + $0x8] sm:$0xff]   ;;  %v1379_v3 = vmov 0.0   ;;  %v1267_v4 = vld [vmem:[%s491_s25] sm:$0xff]   ;;  %vm1380_vm1 = vmmov 0   ;;  %v507_v5 = vpack.c.bf16 %v1547_v0, %v1547_v0  ;;  %vm531_vm2 = vcmask 261120   ;;  %s1381_s25 = smov 120  }
  0x29   : > { %1142 = vmatprep.subr.bf16.mxu0 %v1379_v3  ;;  %1150 = vmatprep.subr.bf16.mxu1 %v1379_v3  ;;  %v1097_v6 = vld [vmem:[%s494_s13] ss:$0 sm:$0xff]  ;;  %vm579_vm3 = vcmask 64512   ;;  %vm643_vm4 = vcmask 1043456   ;;  %s1382_s13 = smov 112   ;;  %p1104_p1 = scmp.ne.s32.totalorder %s1360_s28, 3 }
  0x2a   : > { %1143 = vmatpush3.bf16.msra.mxu0 %v1266_v2  ;;  %1146 = vmatprep.mubr.msk.bf16.mxu0 %vm1380_vm1, %v1379_v3  ;;  %v689_v25 = vld [vmem:[%s1553_s18] sm:$0xf]  ;;  %s1713_s21 = sld [smem:[#allocation18_spill]] (!%p1104_p1) }
  0x2b   : > { %1144 = vmatprep.subr.bf16.mxu0 %v1379_v3  ;;  %1152 = vmatprep.mubr.msk.bf16.mxu1 %vm1380_vm1, %v1379_v3  ;;  %v694_v26 = vsel %vm643_vm4, %v689_v25, 0 }
  0x2e   : > { %1145 = vmatpush3.bf16.msra.mxu0 %v1267_v4  ;;  %v687_v38 = vld [vmem:[#allocation2] sm:$0xff] }
  0x2f   : > { %1156 = vmatprep.subr.bf16.mxu0 %v1379_v3 }
  0x31   : > { %1147 = vmatmul.mubr.msk.bf16.vlgmr.msra.gmra.mxu0 %vm531_vm2, %v507_v5 }
  0x32   : > { %1158 = vmatprep.mubr.msk.bf16.mxu0 %vm1380_vm1, %v1379_v3 }
  0xf1   : > { %v569_v7 = vpop.f32.mrf.mxu0 }
  0xf2   : > { %v570_v8 = vadd.f32 %v1097_v6, %v569_v7 }
  0xf3   : > { %v1148_v9 = vpop.f32.mrf.mxu0 }
  0xf4   : > { %v575_v10 = vpack.c.bf16 %v570_v8, %v570_v8 }
  0xf5   : > { %v572_v11 = vpop.f32.mrf.mxu0 }
  0xf6   : > { %577 = vrot.lane.b32.xlu0 %v575_v10, %s1381_s25 }
  0xf7   : > { %v1149_v12 = vpop.f32.mrf.mxu0 }
 0x168   : > { %v578_v13 = vpop.permute.xlu0 %577 }
 0x169   : > { %v584_v14 = vsel %vm579_vm3, %v578_v13, 0 }
 0x16a   : > { %1151 = vmatpush3.bf16.xpose.msra.mxu1 %v584_v14 }
 0x16b   : > { %1162 = vmatprep.subr.bf16.mxu1 %v1379_v3 }
 0x171   : > { %1153 = vmatmul.mubr.msk.bf16.vlgmr.msra.gmra.mxu1 %vm579_vm3, %v575_v10 }
 0x172   : > { %1164 = vmatprep.mubr.msk.bf16.mxu1 %vm1380_vm1, %v1379_v3  ;;  %1163 = vmatpush3.bf16.msra.mxu1 %v694_v26 }
 0x231   : > { %v620_v15 = vpop.f32.mrf.mxu1 }
 0x232   : > { %v626_v16 = vsel %vm579_vm3, %v620_v15, -inf }
 0x233   : > { %627 = vmax.xlane.f32.xlu0 %v626_v16  ;;  %v1154_v17 = vpop.f32.mrf.mxu1 }
 0x235   : > { %v623_v18 = vpop.f32.mrf.mxu1 }
 0x237   : > { %v1155_v19 = vpop.f32.mrf.mxu1 }
 0x2bc   : > { %v628_v20 = vpop.xlane.xlu0 %627 }
 0x2bd   : > { %v629_v21 = vsub.f32 %v620_v15, %v628_v20 }
 0x2bf   : > { %v630_v22 = vmul.f32 1.442695, %v629_v21 }
 0x2c1   : > { %1268 = vpow2.f32 %v630_v22 }
 0x2ce   : > { %v1269_v23 = vpop.eup %1268 }
 0x2cf   : > { %v632_v24 = vsel %vm579_vm3, %v1269_v23, 0.0 }
 0x2d0   : > { %633 = vadd.xlane.f32.xlu1 %v632_v24 }
 0x2e1   : > { %638 = vrot.lane.b32.xlu1 %v575_v10, %s1382_s13 }
 0x359   : > { %v634_v27 = vpop.xlane.xlu1 %633 }
 0x35a   : > { %1270 = vrcp.f32 %v634_v27 }
 0x35d   : > { %v639_v28 = vpop.permute.xlu1 %638 }
 0x35e   : > { %v645_v29 = vsel %vm643_vm4, %v639_v28, 0 }
 0x35f   : > { %1157 = vmatpush3.bf16.msra.mxu0 %v645_v29 }
 0x367   : > { %v1271_v30 = vpop.eup %1270 }
 0x368   : > { %v636_v31 = vmul.f32 %v1271_v30, %v1269_v23 }
 0x36a   : > { %v637_v32 = vpack.c.bf16 %v636_v31, %v636_v31 }
 0x36c   : > { %1159 = vmatmul.mubr.msk.bf16.vlgmr.msra.gmra.mxu0 %vm579_vm3, %v637_v32 }
 0x42c   : > { %v681_v33 = vpop.f32.mrf.mxu0 }
 0x42d   : > { %v688_v34 = vpack.c.bf16 %v681_v33, %v681_v33 }
 0x42e   : > { %v1160_v35 = vpop.f32.mrf.mxu0 }
 0x42f   : > { %1165 = vmatmul.mubr.msk.bf16.vlgmr.msra.gmra.mxu1 %vm579_vm3, %v688_v34 }
 0x430   : > { %v684_v36 = vpop.f32.mrf.mxu0 }
 0x432   : > { %v1161_v37 = vpop.f32.mrf.mxu0 }
 0x4ef   : > { %v730_v39 = vpop.f32.mrf.mxu1 }
 0x4f0   : > { %v736_v40 = vadd.f32 %v730_v39, %v687_v38 }
 0x4f1   : > { %v1166_v41 = vpop.f32.mrf.mxu1  ;;  %741 = sbr.rel (%p1104_p1) target bundleno = 2311 (0x907), region = 80 }
 0x4f2   : > { %737 = vst.msk [vmem:[#allocation2] sm:$0xff] %vm531_vm2, %v736_v40 }
 0x4f3   : > { %v733_v42 = vpop.f32.mrf.mxu1 }
 0x4f5   : > { %v1167_v43 = vpop.f32.mrf.mxu1 }
 0x4f6   : > { %v1105_v45 = vld [vmem:[%s1673_s4] ss:$0 sm:$0xff]  ;;  %v1272_v54 = vld [vmem:[%s1676_s7 + $0x8] sm:$0xff]   ;;  %v1383_v55 = vmov 0.0   ;;  %vm1384_vm5 = vmmov 0   ;;  %v1274_v3 = vld [vmem:[%s1678_s9 + $0x18] sm:$0xff]  }
 0x4f7   : > { %1168 = vmatprep.subr.bf16.mxu0 %v1383_v55  ;;  %1172 = vmatprep.mubr.msk.bf16.mxu0 %vm1384_vm5, %v1383_v55  ;;  %v1273_v56 = vld [vmem:[%s1676_s7] sm:$0xff]   ;;  %v1275_v4 = vld [vmem:[%s1678_s9 + $0x10] sm:$0xff]   ;;  %v1276_v5 = vld [vmem:[%s1678_s9 + $0x8] sm:$0xff]   ;;  %vm894_vm6 = vcmask 523264  }
 0x4f8   : > { %1169 = vmatpush3.bf16.msra.mxu0 %v1272_v54  ;;  %1176 = vmatprep.subr.bf16.mxu1 %v1383_v55  ;;  %v1106_v61 = vld [vmem:[%s1674_s5] ss:$0 sm:$0xff] }
 0x4f9   : > { %v742_v44 = vld [vmem:[#allocation2] sm:$0xff]  ;;  %1170 = vmatprep.subr.bf16.mxu0 %v1383_v55  ;;  %1184 = vmatprep.mubr.msk.bf16.mxu1 %vm1384_vm5, %v1383_v55 }
 0x4fa   : > { %v750_v46 = vadd.f32 %v1105_v45, %v742_v44  ;;  %v1107_v63 = vld [vmem:[%s1675_s6] ss:$0 sm:$0xff]  ;;  %1177 = vmatpush3.bf16.msra.mxu1 %v1274_v3 }
 0x4fb   : > { %1178 = vmatprep.subr.bf16.mxu1 %v1383_v55  ;;  %v1277_v6 = vld [vmem:[%s1678_s9] sm:$0xff]  }
 0x4fc   : > { %v751_v47 = vadd.f32 %v750_v46, %v1547_v0  ;;  %1171 = vmatpush3.bf16.msra.mxu0 %v1273_v56  ;;  %v1108_v7 = vld [vmem:[%s1677_s8] ss:$0 sm:$0xff] }
 0x4fd   : > { %v1112_v19 = vld [vmem:[%s1679_s10] ss:$0 sm:$0xff] }
 0x4fe   : > { %v754_v48 = vsel %vm531_vm2, %v751_v47, 0.0  ;;  %1179 = vmatpush3.bf16.msra.mxu1 %v1275_v4  ;;  %v1118_v36 = vld [vmem:[%s1680_s11] ss:$0 sm:$0xff] }
 0x4ff   : > { %755 = vadd.xlane.f32.xlu0 %v754_v48  ;;  %1180 = vmatprep.subr.bf16.mxu1 %v1383_v55  ;;  %v1119_v38 = vld [vmem:[%s1713_s21] ss:$0 sm:$0xff] }
 0x502   : > { %1181 = vmatpush3.bf16.msra.mxu1 %v1276_v5 }
 0x503   : > { %1182 = vmatprep.subr.bf16.mxu1 %v1383_v55 }
 0x506   : > { %1183 = vmatpush3.bf16.msra.mxu1 %v1277_v6 }
 0x588   : > { %v756_v49 = vpop.xlane.xlu0 %755 }
 0x589   : > { %v758_v50 = vmul.f32 0.03125, %v756_v49 }
 0x58b   : > { %v759_v51 = vsub.f32 %v751_v47, %v758_v50 }
 0x58d   : > { %v760_v52 = vmul.f32 %v759_v51, %v759_v51 }
 0x58f   : > { %v761_v53 = vsel %vm531_vm2, %v760_v52, 0.0 }
 0x590   : > { %762 = vadd.xlane.f32.xlu0 %v761_v53 }
 0x619   : > { %v763_v57 = vpop.xlane.xlu0 %762 }
 0x61a   : > { %v764_v58 = vmul.f32 0.03125, %v763_v57 }
 0x61c   : > { %v765_v59 = vadd.f32 1e-05, %v764_v58 }
 0x61e   : > { %1278 = vrsqrt.f32 %v765_v59 }
 0x62b   : > { %v1279_v60 = vpop.eup %1278 }
 0x62c   : > { %v767_v62 = vmul.f32 %v1279_v60, %v759_v51 }
 0x62e   : > { %v774_v0 = vmul.f32 %v1106_v61, %v767_v62 }
 0x630   : > { %v781_v1 = vadd.f32 %v1107_v63, %v774_v0 }
 0x632   : > { %v782_v2 = vpack.c.bf16 %v781_v1, %v781_v1 }
 0x634   : > { %1173 = vmatmul.mubr.msk.bf16.vlgmr.msra.gmra.mxu0 %vm531_vm2, %v782_v2 }
 0x6f4   : > { %v843_v8 = vpop.f32.mrf.mxu0 }
 0x6f5   : > { %v844_v9 = vadd.f32 %v1108_v7, %v843_v8 }
 0x6f6   : > { %v1174_v10 = vpop.f32.mrf.mxu0 }
 0x6f7   : > { %v850_v11 = vmul.f32 0.70710677, %v844_v9  ;;  %v849_v15 = vmul.f32 0.5, %v844_v9 }
 0x6f8   : > { %v846_v12 = vpop.f32.mrf.mxu0 }
 0x6f9   : > { %1280 = verf.f32 %v850_v11 }
 0x6fa   : > { %v1175_v13 = vpop.f32.mrf.mxu0 }
 0x706   : > { %v1281_v14 = vpop.eup %1280 }
 0x707   : > { %v852_v16 = vadd.f32 1.0, %v1281_v14 }
 0x709   : > { %v853_v17 = vmul.f32 %v852_v16, %v849_v15 }
 0x70b   : > { %v854_v18 = vpack.c.bf16 %v853_v17, %v853_v17 }
 0x70d   : > { %1185 = vmatmul.mubr.msk.bf16.vlgmr.msra.gmra.mxu1 %vm894_vm6, %v854_v18 }
 0x7cd   : > { %v932_v20 = vpop.f32.mrf.mxu1 }
 0x7ce   : > { %v933_v21 = vadd.f32 %v1112_v19, %v932_v20 }
 0x7cf   : > { %v1186_v22 = vpop.f32.mrf.mxu1 }
 0x7d0   : > { %v938_v23 = vadd.f32 %v933_v21, %v781_v1 }
 0x7d1   : > { %v935_v24 = vpop.f32.mrf.mxu1 }
 0x7d2   : > { %v941_v25 = vsel %vm531_vm2, %v938_v23, 0.0 }
 0x7d3   : > { %942 = vadd.xlane.f32.xlu1 %v941_v25  ;;  %v1187_v26 = vpop.f32.mrf.mxu1 }
 0x85c   : > { %v943_v27 = vpop.xlane.xlu1 %942 }
 0x85d   : > { %v944_v28 = vmul.f32 0.03125, %v943_v27 }
 0x85f   : > { %v945_v29 = vsub.f32 %v938_v23, %v944_v28 }
 0x861   : > { %v946_v30 = vmul.f32 %v945_v29, %v945_v29 }
 0x863   : > { %v947_v31 = vsel %vm531_vm2, %v946_v30, 0.0 }
 0x864   : > { %948 = vadd.xlane.f32.xlu1 %v947_v31 }
 0x8ed   : > { %v949_v32 = vpop.xlane.xlu1 %948 }
 0x8ee   : > { %v950_v33 = vmul.f32 0.03125, %v949_v32 }
 0x8f0   : > { %v951_v34 = vadd.f32 1e-05, %v950_v33 }
 0x8f2   : > { %1282 = vrsqrt.f32 %v951_v34 }
 0x8ff   : > { %v1283_v35 = vpop.eup %1282 }
 0x900   : > { %v953_v37 = vmul.f32 %v1283_v35, %v945_v29 }
 0x902   : > { %v960_v39 = vmul.f32 %v1118_v36, %v953_v37 }
 0x904   : > { %v967_v40 = vadd.f32 %v1119_v38, %v960_v39 }
 0x906   : > { %968 = vst.msk [vmem:[%s482_s12] sm:$0xff] %vm531_vm2, %v967_v40 }
 0x907 PF: > { %s1714_s24 = sld [smem:[#allocation9_spill]]  ;;  %s983_s27 = sshll.u32 %s482_s12, 4  ;;  %s984_s27 = int_to_ptr.vmem [resolvable:$true] %s983_s27 }
 0x908   : > { %s1715_s16 = sld [smem:[#allocation7_spill]]  ;;  %s1284_s30 = scalar_lea.vmem %s984_s27, 128 }
 0x909   : > { %s1717_s13 = sld [smem:[#allocation19_spill]]  ;;  %p1285_p2 = scmp.ne.s32.totalorder %s984_s27, %s1284_s30 }
 0x90a   : > { %s1385_s14 = smov [#allocation3]  }
 0x90b   : > { %p1286_p4 = pnand %p1285_p2, %p1505_p3  ;;  %s1288_s15 = sshll.u32 %s1385_s14, 4  ;;  %s1289_s15 = int_to_ptr.vmem [resolvable:$false] %s1288_s15 }
 0x90c   : > { %s1290_s19 = scalar_lea.vmem %s1289_s15, 256  ;;  %p1291_p6 = scmp.lt.s32.totalorder %s984_s27, %s1289_s15 }
 0x90d   : > { %s1121_s23 = sshll.u32 %s1714_s24, 7  ;;  %p1287_p5 = pneg %p1286_p4 }
 0x90e   : > { %s1718_s28 = sand.u32 1, %s1715_s16   ;;  %p1292_p7 = scmp.lt.s32.totalorder %s1290_s19, %s1284_s30 }
 0x90f   : > { %s981_s26 = scalar_lea.hbm %s1717_s13, %s1121_s23  ;;  %s970_s29 = scalar_lea.sflag [#allocation4], %s1718_s28 }
 0x910   : > { %p1293_p8 = por %p1292_p7, %p1291_p6 }
 0x912   : > { %p1294_p10 = pnand %p1293_p8, %p1287_p5 }
 0x914   : > { %1297 = shalt.err (!%p1294_p10)
}
 0x915   : > { %s1298_s20 = scalar_lea.hbm %s981_s26, 128  ;;  %s1302_s21 = scalar_lea.hbm %s1717_s13, 256 }
 0x916   : > { %p1299_p11 = scmp.ne.s32.totalorder %s981_s26, %s1298_s20  ;;  %p1303_p0 = scmp.lt.s32.totalorder %s981_s26, %s1717_s13 }
 0x917   : > { %p1304_p1 = scmp.lt.s32.totalorder %s1302_s21, %s1298_s20 }
 0x918   : > { %p1300_p12 = pnand %p1299_p11, %p1505_p3 }
 0x919   : > { %p1305_p2 = por %p1304_p1, %p1303_p0 }
 0x91a   : > { %p1301_p13 = pneg %p1300_p12 }
 0x91c   : > { %p1306_p4 = pnand %p1305_p2, %p1301_p13 }
 0x91e   : > { %1309 = shalt.err (!%p1306_p4)
}
 0x91f   : > { %1188 = dma.vmem_to_hbm [thread:$0]  (%p1505_p3), %s984_s27, 128, %s981_s26, %s970_s29  }
 0x920 PF: > { %s1719_s23 = sld [smem:[#allocation12_spill]] }
 0x921   : > { %s1720_s18 = sld [smem:[#allocation6_spill]] }
 0x926   : > { %p1194_p5 = scmp.ge.s32.totalorder %s1719_s23, 2 }
 0x927   : > { %s995_s28 = sand.u32 1, %s1720_s18  }
 0x928   : > { %p1191_p6 = pnand %p1194_p5, %p1515_p9  ;;  %s996_s30 = scalar_lea.sflag [#allocation4], %s995_s28 }
 0x92a   : > { %p1192_p7 = pneg %p1191_p6 }
 0x92c   : > { %1343 = dma.done.wait (%p1192_p7), %s996_s30, 128  }
 0x92d   : > { %1345 = vsyncadd (%p1192_p7), %s996_s30, 4294967168  ;;  %s26_s15 = sadd.s32 1, %s1719_s23   ;;  %s1722_s25 = sld [smem:[#allocation7_spill]] }
 0x92e   : > { %p23_p8 = scmp.ge.s32.totalorder %s26_s15, 10   ;;  %s1723_s26 = sld [smem:[#allocation8_spill]] }
 0x92f   : > { %s1724_s27 = sld [smem:[#allocation17_spill]] }
 0x930   : > { %s1725_s28 = sld [smem:[#allocation10_spill]]  ;;  %25 = sbr.rel (!%p23_p8) target bundleno = 8 (0x8), region = 124 }
 0x931   : > { %s1726_s29 = sld [smem:[#allocation11_spill]] }
 0x932   : > { %s1727_s30 = sld [smem:[#allocation13_spill]] }
 0x933   : > { %s1728_s14 = sld [smem:[#allocation15_spill]] }
 0x935   :  { %1001 = vsyncpa [#allocation4], 1 }
 0x936   :  { %1003 = vsyncpa [#allocation4 + $0x1], 1 }

</bundles_post_ra>
